<compile_context>
chip_gen: v6e
topology: v6e:2x2x1
jax: 0.10.0
libtpu: 0.0.40
codegen_flags: <defaults>
</compile_context>

<pallas_src>
import jax
import jax.numpy as jnp
from jax.experimental import pallas as pl
from jax.experimental.pallas import tpu as pltpu


_LANE = 128            # lanes per vreg
_CHUNK = 2048          # inner lane-chunk: intermediates stay vreg-sized
_TB_CAP = 64 * 1024    # max lanes per grid step (fits scoped VMEM on v5e/v6e/v7x)


def _round_up(x, m):
    return ((x + m - 1) // m) * m


def _pick_batch_tiling(batch):
    """Return (tb, b_pad, grid): lane-tile size, padded batch, grid length."""
    b_pad = _round_up(max(batch, _LANE), _LANE)
    if b_pad <= _LANE:
        return _LANE, _LANE, 1
    # >=2 grid steps so v7x's two TensorCores both get work; cap tile at 64K
    # lanes so x (double-buffered) + output fit default scoped VMEM everywhere.
    steps = max(2, pl.cdiv(b_pad, _TB_CAP))
    tb = _round_up(pl.cdiv(b_pad, steps), _LANE)
    if tb > _CHUNK:
        tb = _round_up(tb, _CHUNK)      # inner chunk loop must divide the tile
    tb = min(tb, _TB_CAP)
    b_pad = _round_up(b_pad, tb)
    return tb, b_pad, b_pad // tb


def mlp_kernel(x_ref, w1_ref, b1_ref, w2_ref, b2_ref, w3_ref, b3_ref, o_ref):
    w1, b1 = w1_ref[...], b1_ref[...]
    w2, b2 = w2_ref[...], b2_ref[...]
    w3, b3 = w3_ref[...], b3_ref[...]

    tb = x_ref.shape[1]
    chunk = min(_CHUNK, tb)     # both are multiples of 128; chunk divides tb
    n_chunks = tb // chunk

    # Inner lane-chunk loop: h1/h2/h3 stay small (vreg-sized) instead of
    # becoming multi-MiB VMEM temporaries, freeing VMEM for a bigger x tile.
    @pl.loop(0, n_chunks)
    def _(c):
        off = pl.multiple_of(c * chunk, _LANE)
        x = x_ref[:, pl.ds(off, chunk)]                                   # (in_dim, chunk)
        # Layer 1: Linear(in_dim, 12) + ReLU
        h1 = jnp.dot(w1, x, preferred_element_type=jnp.float32) + b1      # (12, chunk)
        h1 = jnp.maximum(h1, 0.0)
        # Layer 2: Linear(12, 6) + Tanh
        h2 = jnp.dot(w2, h1, preferred_element_type=jnp.float32) + b2     # (6, chunk)
        h2 = jnp.tanh(h2)
        # Layer 3: Linear(6, 1) + Sigmoid
        h3 = jnp.dot(w3, h2, preferred_element_type=jnp.float32) + b3     # (1, chunk)
        o_ref[:, pl.ds(off, chunk)] = jax.nn.sigmoid(h3)                  # lane-dense store


def mlp_forward_t(x_t, params):
    """Forward pass with x already in kernel layout: x_t is [in_dim, B] f32.

    This entry point avoids the wrapper-side transpose pass over x entirely
    (only pads lanes if B is not a multiple of 128). Returns [1, B].
    """
    in_dim, B = x_t.shape
    w1, b1 = params["w1"], params["b1"]   # (12, in_dim), (12, 1)
    w2, b2 = params["w2"], params["b2"]   # (6, 12),      (6, 1)
    w3, b3 = params["w3"], params["b3"]   # (1, 6),       (1, 1)

    tb, b_pad, grid = _pick_batch_tiling(B)
    if b_pad != B:
        # Zero padding: padded lanes produce finite, discarded outputs.
        x_t = jnp.pad(x_t, ((0, 0), (0, b_pad - B)))

    const = lambda shape: pl.BlockSpec(shape, lambda i: (0, 0))

    cost = pl.CostEstimate(
        flops=2 * b_pad * (in_dim * 12 + 12 * 6 + 6 * 1),
        transcendentals=b_pad * (6 + 1),
        bytes_accessed=4 * b_pad * (16 + 8)   # sublane-padded x read + out write
        + 4 * (w1.size + b1.size + w2.size + b2.size + w3.size + b3.size),
    )

    out_t = pl.pallas_call(
        mlp_kernel,
        out_shape=jax.ShapeDtypeStruct((1, b_pad), jnp.float32),
        grid=(grid,),
        in_specs=[
            pl.BlockSpec((in_dim, tb), lambda i: (0, i)),   # x tile, pipelined
            const(w1.shape), const(b1.shape),               # weights VMEM-resident
            const(w2.shape), const(b2.shape),
            const(w3.shape), const(b3.shape),
        ],
        out_specs=pl.BlockSpec((1, tb), lambda i: (0, i)),  # lane-dense output slab
        compiler_params=pltpu.CompilerParams(
            dimension_semantics=("parallel",),              # shard steps over v7x's 2 TCs
            vmem_limit_bytes=32 * 1024 * 1024,              # headroom; <= physical on all chips
        ),
        cost_estimate=cost,
    )(x_t, w1, b1, w2, b2, w3, b3)

    return out_t[:, :B]   # [1, B]


def mlp_forward(x, params):
    """PyTorch-convention forward: x is [B, in_dim] f32, returns [B, 1] f32.

    NOTE: for large B, prefer producing x directly as [in_dim, B] and calling
    mlp_forward_t to skip this extra transpose/pad HBM pass (perf review item).
    """
    return mlp_forward_t(x.T, params).T


def init_params(key, in_dim):
    """Deterministic init matching nn.Linear: W is [out, in], b stored [out, 1]."""
    ks = jax.random.split(key, 6)

    def lin(kw, kb, fan_in, fan_out):
        bound = 1.0 / jnp.sqrt(fan_in)
        w = jax.random.uniform(kw, (fan_out, fan_in), jnp.float32, -bound, bound)
        b = jax.random.uniform(kb, (fan_out, 1), jnp.float32, -bound, bound)
        return w, b

    w1, b1 = lin(ks[0], ks[1], in_dim, 12)
    w2, b2 = lin(ks[2], ks[3], 12, 6)
    w3, b3 = lin(ks[4], ks[5], 6, 1)
    return {"w1": w1, "b1": b1, "w2": w2, "b2": b2, "w3": w3, "b3": b3}


def mlp_ref(x, p):
    h1 = jnp.maximum(x @ p["w1"].T + p["b1"].T, 0.0)
    h2 = jnp.tanh(h1 @ p["w2"].T + p["b2"].T)
    return jax.nn.sigmoid(h2 @ p["w3"].T + p["b3"].T)


if __name__ == "__main__":
    key = jax.random.PRNGKey(0)
    k_x, k_x2, k_p = jax.random.split(key, 3)

    in_dim = 9  # Titanic-style feature count
    params = init_params(k_p, in_dim)

    # Small batch (single grid step).
    batch = 8
    x = jax.random.normal(k_x, (batch, in_dim), dtype=jnp.float32)
    out = jax.block_until_ready(mlp_forward(x, params))
    ref = mlp_ref(x, params)
    assert out.shape == (batch, 1), out.shape
    assert jnp.allclose(out, ref, atol=1e-5, rtol=1e-5), (out, ref)

    # Slightly larger batch: exercises the >=2-step grid and the padded tail,
    # via the transpose-free entry point (batch on the lane axis).
    batch2 = 300
    x2_t = jax.random.normal(k_x2, (in_dim, batch2), dtype=jnp.float32)
    out2 = jax.block_until_ready(mlp_forward_t(x2_t, params))
    ref2 = mlp_ref(x2_t.T, params)
    assert out2.shape == (1, batch2), out2.shape
    assert jnp.allclose(out2.T, ref2, atol=1e-5, rtol=1e-5)

    print("KERNEL_OK")
</pallas_src>

<mosaic_0001>
module attributes {stable_mosaic.version = 11 : i64} {
  func.func @mlp_kernel(%arg0: i32, %arg1: memref<9x128xf32, #tpu.memory_space<vmem>>, %arg2: memref<12x9xf32, #tpu.memory_space<vmem>>, %arg3: memref<12x1xf32, #tpu.memory_space<vmem>>, %arg4: memref<6x12xf32, #tpu.memory_space<vmem>>, %arg5: memref<6x1xf32, #tpu.memory_space<vmem>>, %arg6: memref<1x6xf32, #tpu.memory_space<vmem>>, %arg7: memref<1x1xf32, #tpu.memory_space<vmem>>, %arg8: memref<1x128xf32, #tpu.memory_space<vmem>>) attributes {dimension_semantics = [#tpu.dimension_semantics<parallel>], iteration_bounds = array<i64: 1>, scalar_prefetch = 0 : i64, scratch_operands = 0 : i64, tpu.core_type = #tpu.core_type<tc>, window_params = [{transform_indices = @transform_0, window_bounds = array<i64: 9, 128>}, {pipeline_mode = #tpu.pipeline_mode<synchronous>, transform_indices = @transform_1, window_bounds = array<i64: 12, 9>}, {pipeline_mode = #tpu.pipeline_mode<synchronous>, transform_indices = @transform_2, window_bounds = array<i64: 12, 1>}, {pipeline_mode = #tpu.pipeline_mode<synchronous>, transform_indices = @transform_3, window_bounds = array<i64: 6, 12>}, {pipeline_mode = #tpu.pipeline_mode<synchronous>, transform_indices = @transform_4, window_bounds = array<i64: 6, 1>}, {pipeline_mode = #tpu.pipeline_mode<synchronous>, transform_indices = @transform_5, window_bounds = array<i64: 1, 6>}, {pipeline_mode = #tpu.pipeline_mode<synchronous>, transform_indices = @transform_6, window_bounds = array<i64: 1, 1>}, {transform_indices = @transform_7, window_bounds = array<i64: 1, 128>}]} {
    %c0 = arith.constant 0 : index
    %c0_0 = arith.constant 0 : index
    %0 = vector.load %arg2[%c0, %c0_0] : memref<12x9xf32, #tpu.memory_space<vmem>>, vector<12x9xf32>
    %c0_1 = arith.constant 0 : index
    %c0_2 = arith.constant 0 : index
    %1 = vector.load %arg3[%c0_1, %c0_2] : memref<12x1xf32, #tpu.memory_space<vmem>>, vector<12x1xf32>
    %c0_3 = arith.constant 0 : index
    %c0_4 = arith.constant 0 : index
    %2 = vector.load %arg4[%c0_3, %c0_4] : memref<6x12xf32, #tpu.memory_space<vmem>>, vector<6x12xf32>
    %c0_5 = arith.constant 0 : index
    %c0_6 = arith.constant 0 : index
    %3 = vector.load %arg5[%c0_5, %c0_6] : memref<6x1xf32, #tpu.memory_space<vmem>>, vector<6x1xf32>
    %c0_7 = arith.constant 0 : index
    %c0_8 = arith.constant 0 : index
    %4 = vector.load %arg6[%c0_7, %c0_8] : memref<1x6xf32, #tpu.memory_space<vmem>>, vector<1x6xf32>
    %c0_9 = arith.constant 0 : index
    %c0_10 = arith.constant 0 : index
    %5 = vector.load %arg7[%c0_9, %c0_10] : memref<1x1xf32, #tpu.memory_space<vmem>>, vector<1x1xf32>
    %c0_i32 = arith.constant 0 : i32
    %c1_i32 = arith.constant 1 : i32
    %6 = arith.muli %c0_i32, %c1_i32 : i32
    %c0_i32_11 = arith.constant 0 : i32
    %7 = arith.addi %c0_i32_11, %6 : i32
    %c128_i32 = arith.constant 128 : i32
    %8 = arith.muli %7, %c128_i32 : i32
    %9 = tpu.assume_multiple %8, 128 : i32
    %c0_12 = arith.constant 0 : index
    %10 = arith.index_cast %9 : i32 to index
    %11 = vector.load %arg1[%c0_12, %10] : memref<9x128xf32, #tpu.memory_space<vmem>>, vector<9x128xf32>
    %cst = arith.constant dense<0.000000e+00> : vector<12x128xf32>
    %12 = tpu.matmul %0, %11, %cst {dimension_numbers = #tpu.dot_dimension_numbers<[1], [0], [0], [1], [0, 0, 1, 1], [], []>} : vector<12x9xf32>, vector<9x128xf32>, vector<12x128xf32> -> vector<12x128xf32>
    %13 = vector.broadcast %1 : vector<12x1xf32> to vector<12x128xf32>
    %14 = arith.addf %12, %13 : vector<12x128xf32>
    %cst_13 = arith.constant 0.000000e+00 : f32
    %15 = vector.broadcast %cst_13 : f32 to vector<12x128xf32>
    %16 = arith.maximumf %14, %15 : vector<12x128xf32>
    %cst_14 = arith.constant dense<0.000000e+00> : vector<6x128xf32>
    %17 = tpu.matmul %2, %16, %cst_14 {dimension_numbers = #tpu.dot_dimension_numbers<[1], [0], [0], [1], [0, 0, 1, 1], [], []>} : vector<6x12xf32>, vector<12x128xf32>, vector<6x128xf32> -> vector<6x128xf32>
    %18 = vector.broadcast %3 : vector<6x1xf32> to vector<6x128xf32>
    %19 = arith.addf %17, %18 : vector<6x128xf32>
    %20 = math.tanh %19 : vector<6x128xf32>
    %cst_15 = arith.constant dense<0.000000e+00> : vector<1x128xf32>
    %21 = tpu.matmul %4, %20, %cst_15 {dimension_numbers = #tpu.dot_dimension_numbers<[1], [0], [0], [1], [0, 0, 1, 1], [], []>} : vector<1x6xf32>, vector<6x128xf32>, vector<1x128xf32> -> vector<1x128xf32>
    %22 = vector.broadcast %5 : vector<1x1xf32> to vector<1x128xf32>
    %23 = arith.addf %21, %22 : vector<1x128xf32>
    %24 = arith.negf %23 : vector<1x128xf32>
    %25 = math.exp %24 : vector<1x128xf32>
    %cst_16 = arith.constant 1.000000e+00 : f32
    %26 = vector.broadcast %cst_16 : f32 to vector<1x128xf32>
    %27 = arith.addf %26, %25 : vector<1x128xf32>
    %28 = arith.divf %26, %27 : vector<1x128xf32>
    %c0_17 = arith.constant 0 : index
    %29 = arith.index_cast %9 : i32 to index
    %30 = vector.load %arg8[%c0_17, %29] : memref<1x128xf32, #tpu.memory_space<vmem>>, vector<1x128xf32>
    tpu.vector_store %arg8[%c0_17, %29], %28 {strides = array<i32>} : memref<1x128xf32, #tpu.memory_space<vmem>>, vector<1x128xf32>,
    %c1_i32_18 = arith.constant 1 : i32
    return
  }
  func.func @transform_0(%arg0: i32) -> (i32, i32) {
    %c0_i32 = arith.constant 0 : i32
    %c0_i32_0 = arith.constant 0 : i32
    return %c0_i32, %arg0 : i32, i32
  }
  func.func @transform_1(%arg0: i32) -> (i32, i32) {
    %c0_i32 = arith.constant 0 : i32
    %c0_i32_0 = arith.constant 0 : i32
    %c0_i32_1 = arith.constant 0 : i32
    return %c0_i32, %c0_i32_0 : i32, i32
  }
  func.func @transform_2(%arg0: i32) -> (i32, i32) {
    %c0_i32 = arith.constant 0 : i32
    %c0_i32_0 = arith.constant 0 : i32
    %c0_i32_1 = arith.constant 0 : i32
    return %c0_i32, %c0_i32_0 : i32, i32
  }
  func.func @transform_3(%arg0: i32) -> (i32, i32) {
    %c0_i32 = arith.constant 0 : i32
    %c0_i32_0 = arith.constant 0 : i32
    %c0_i32_1 = arith.constant 0 : i32
    return %c0_i32, %c0_i32_0 : i32, i32
  }
  func.func @transform_4(%arg0: i32) -> (i32, i32) {
    %c0_i32 = arith.constant 0 : i32
    %c0_i32_0 = arith.constant 0 : i32
    %c0_i32_1 = arith.constant 0 : i32
    return %c0_i32, %c0_i32_0 : i32, i32
  }
  func.func @transform_5(%arg0: i32) -> (i32, i32) {
    %c0_i32 = arith.constant 0 : i32
    %c0_i32_0 = arith.constant 0 : i32
    %c0_i32_1 = arith.constant 0 : i32
    return %c0_i32, %c0_i32_0 : i32, i32
  }
  func.func @transform_6(%arg0: i32) -> (i32, i32) {
    %c0_i32 = arith.constant 0 : i32
    %c0_i32_0 = arith.constant 0 : i32
    %c0_i32_1 = arith.constant 0 : i32
    return %c0_i32, %c0_i32_0 : i32, i32
  }
  func.func @transform_7(%arg0: i32) -> (i32, i32) {
    %c0_i32 = arith.constant 0 : i32
    %c0_i32_0 = arith.constant 0 : i32
    return %c0_i32, %arg0 : i32, i32
  }
}

</mosaic_0001>

<bundles_post_ra>
// kernel: tpu_custom_call.1
= control target key start
LH: loop header
LB: loop body
LE: loop exit
PB: predicated region body
PF: predicated region fallthrough
CT: control target
= control target key end

     0   :  { %s516_s0 = inlined_call_operand.vmem [shape: f32[9,128], index: 0, kind: input, shape index: {}]   ;;  %s517_s1 = inlined_call_operand.hbm [shape: f32[12,9], index: 1, kind: input, shape index: {}]   ;;  %s518_s2 = inlined_call_operand.vmem [shape: f32[12,1], index: 2, kind: input, shape index: {}]   ;;  %s519_s3 = inlined_call_operand.vmem [shape: f32[6,12], index: 3, kind: input, shape index: {}]   ;;  %s520_s4 = inlined_call_operand.vmem [shape: f32[6,1], index: 4, kind: input, shape index: {}]   ;;  %s521_s5 = inlined_call_operand.vmem [shape: f32[1,6], index: 5, kind: input, shape index: {}]   ;;  %s522_s6 = inlined_call_operand.<no memory space> [shape: f32[1,1], index: 6, kind: input, shape index: {}]   ;;  %s523_s7 = inlined_call_operand.hbm [shape: f32[1,128], index: 7, kind: output, shape index: {}]  }
   0x1   :  { %v12_v0 = vstv %s522_s6 }
   0x2   :  { %13 = vst [vmem:[#allocation2] sm:$0x1] %v12_v0 }
   0x3   :  { %14 = vsyncpa [#allocation4], 0 }
   0x4   :  { %15 = vsyncpa [#allocation5], 0  ;;  %s439_s26 = smov [#allocation3]  }
   0x5   :  { %s23_s27 = sshll.u32 %s439_s26, 4  ;;  %s24_s27 = int_to_ptr.vmem [resolvable:$true] %s23_s27 }
   0x6   :  { %s403_s28 = scalar_lea.vmem %s24_s27, 256  ;;  %p408_p1 = scmp.lt.s32.totalorder %s24_s27, %s24_s27 }
   0x7   :  { %p404_p0 = scmp.ne.s32.totalorder %s24_s27, %s403_s28  ;;  %p409_p2 = scmp.lt.s32.totalorder %s403_s28, %s403_s28 }
   0x9   :  { %p410_p3 = por %p409_p2, %p408_p1 }
   0xb   :  { %p411_p4 = pnand %p410_p3, %p404_p0 }
   0xd   :  { %414 = shalt.err (!%p411_p4)
}
   0xe   :  { %s440_s29 = smov 128   ;;  %s441_s30 = smov 8  }
   0xf   :  { %29 = dma.hbm_to_vmem [thread:$0]  %s517_s1, 256, %s24_s27, [#allocation4], %s440_s29, %s440_s29, %s441_s30  }
  0x10   :  { %435 = dma.done.wait [#allocation4], 256  }
  0x11   :  { %436 = vsyncadd [#allocation4], 4294967040  ;;  %v442_v1 = vmov 0   ;;  %vm70_vm0 = vcmask 1040384   ;;  %vm63_vm1 = vcmask 72704   ;;  %v51_v3 = vld [vmem:[%s516_s0] sm:$0xff]  ;;  %v240_v26 = vlaneseq }
  0x12   :  { %387 = vset.pattern.permute.xlu0 %v442_v1  ;;  %388 = vset.pattern.permute.xlu1 %v442_v1  ;;  %v52_v2 = vld [vmem:[%s516_s0 + $0x8] sm:$0x1]  ;;  %v44_v6 = vld [vmem:[#allocation3 + $0x8] sm:$0xf]  ;;  %v45_v7 = vld [vmem:[%s518_s2] sm:$0xff]  ;;  %v443_v8 = vmov 0.0  }
  0x13   :  { %v43_v4 = vld [vmem:[#allocation3] sm:$0xff]  ;;  %361 = vmatprep.subr.msk.mxu0 %vm70_vm0, %v52_v2  ;;  %368 = vmatprep.subr.mxu1 %v443_v8  ;;  %vm444_vm2 = vmmov 0   ;;  %v50_v10 = vld [vmem:[#allocation2] sm:$0x1]  ;;  %vm160_vm3 = vcmask 1043456   ;;  %vm156_vm4 = vcmask 97280  }
  0x14   :  { %365 = vmatprep.mubr.msk.f32.mxu0 %vm63_vm1, %v43_v4  ;;  %v46_v5 = vld [vmem:[%s518_s2 + $0x8] sm:$0xf]  ;;  %362 = vmatpush3.msk.msra.mxu0 %vm70_vm0, %v52_v2  ;;  %v48_v9 = vld [vmem:[%s520_s4] sm:$0x3f]  ;;  %vm248_vm5 = vcmask 1045504   ;;  %vm244_vm6 = vcmask 48128  }
  0x15   :  { %60 = vperm.xlu0 %387, %v46_v5   ;;  %363 = vmatprep.subr.mxu0 %v51_v3  ;;  %v47_v19 = vld [vmem:[%s519_s3] sm:$0x3f]  ;;  %v241_v27 = vshrl.u32 %v240_v26, 7  ;;  %s445_s3 = smov [#allocation6]  }
  0x16   :  { %364 = vmatpush3.msra.mxu0 %v51_v3  ;;  %372 = vmatprep.mubr.msk.f32.mxu1 %vm444_vm2, %v443_v8  ;;  %v49_v24 = vld [vmem:[%s521_s5] sm:$0x1]  ;;  %s335_s19 = sshll.u32 %s445_s3, 4  ;;  %s336_s19 = int_to_ptr.vmem [resolvable:$true] %s335_s19 }
  0x17   :  { %366 = vmatmul.mubr.msk.f32.vlgmr.msra.gmra.mxu0 %vm63_vm1, %v44_v6  ;;  %375 = vmatprep.subr.mxu0 %v443_v8  ;;  %v242_v28 = vsub.s32 0, %v241_v27  ;;  %s415_s5 = scalar_lea.vmem %s336_s19, 16  ;;  %s419_s20 = scalar_lea.vmem %s336_s19, 32 }
  0x18   :  { %377 = vmatprep.mubr.msk.f32.mxu0 %vm444_vm2, %v443_v8  ;;  %153 = vperm.xlu1 %388, %v48_v9   ;;  %p416_p5 = scmp.ne.s32.totalorder %s336_s19, %s415_s5  ;;  %p420_p6 = scmp.lt.s32.totalorder %s336_s19, %s336_s19 }
  0x19   :  { %55 = vperm.xlu0 %387, %v45_v7   ;;  %p421_p7 = scmp.lt.s32.totalorder %s419_s20, %s415_s5 }
  0x1b   :  { %p422_p8 = por %p421_p7, %p420_p6 }
  0x1c   :  { %237 = vperm.xlu1 %388, %v50_v10  }
  0x1d   :  { %p423_p9 = pnand %p422_p8, %p416_p5 }
  0x90   :  { %v61_v11 = vpop.permute.xlu0 %60 }
  0x93   :  { %v154_v20 = vpop.permute.xlu1 %153 }
  0x94   :  { %v56_v14 = vpop.permute.xlu0 %55 }
  0x97   :  { %v238_v29 = vpop.permute.xlu1 %237 }
  0x98   :  { %v243_v30 = vrot.slane %v238_v29, %v242_v28 }
  0xd7   :  { %v367_v12 = vpop.f32.mrf.mxu0 }
  0xd8   :  { %v146_v13 = vadd.f32 %v367_v12, %v61_v11 }
  0xd9   :  { %v140_v15 = vpop.f32.mrf.mxu0 }
  0xda   :  { %v150_v16 = vmax.f32 %v146_v13, 0.0  ;;  %v141_v17 = vadd.f32 %v140_v15, %v56_v14 }
  0xdc   :  { %v149_v18 = vmax.f32 %v141_v17, 0.0  ;;  %369 = vmatpush3.msk.msra.mxu1 %vm160_vm3, %v150_v16 }
  0xdd   :  { %370 = vmatprep.subr.mxu1 %v443_v8 }
  0xde   :  { %371 = vmatpush3.msra.mxu1 %v149_v18 }
  0xdf   :  { %373 = vmatmul.mubr.msk.f32.vlgmr.msra.gmra.mxu1 %vm156_vm4, %v47_v19 }
 0x19f   :  { %v230_v21 = vpop.f32.mrf.mxu1 }
 0x1a0   :  { %v231_v22 = vadd.f32 %v230_v21, %v154_v20 }
 0x1a1   :  { %v374_v23 = vpop.f32.mrf.mxu1 }
 0x1a2   :  { %389 = vtanh.f32 %v231_v22 }
 0x1af   :  { %v390_v25 = vpop.eup %389 }
 0x1b0   :  { %376 = vmatpush3.msk.msra.mxu0 %vm248_vm5, %v390_v25 }
 0x1b1   :  { %378 = vmatmul.mubr.msk.f32.vlgmr.msra.gmra.mxu0 %vm244_vm6, %v49_v24 }
 0x271   :  { %v318_v31 = vpop.f32.mrf.mxu0 }
 0x272   :  { %v319_v32 = vadd.f32 %v318_v31, %v243_v30 }
 0x273   :  { %v379_v33 = vpop.f32.mrf.mxu0 }
 0x274   :  { %v351_v34 = vmul.f32 -1.442695, %v319_v32 }
 0x276   :  { %391 = vpow2.f32 %v351_v34 }
 0x283   :  { %v392_v35 = vpop.eup %391 }
 0x284   :  { %v325_v36 = vadd.f32 1.0, %v392_v35 }
 0x286   :  { %393 = vrcp.f32 %v325_v36 }
 0x293   :  { %v394_v37 = vpop.eup %393 }
 0x294   :  { %328 = vst [vmem:[#allocation6] sm:$0x1] %v394_v37 }
 0x295   :  { %426 = shalt.err (!%p423_p9)
}
 0x296   :  { %338 = dma.vmem_to_hbm [thread:$0]  %s336_s19, 16, %s523_s7, [#allocation5]  }
 0x297   :  { %437 = dma.done.wait [#allocation5], 16  }
 0x298   :  { %438 = vsyncadd [#allocation5], 4294967280 }
 0x299   :  { %342 = vsyncpa [#allocation4], 1 }
 0x29a   :  { %343 = vsyncpa [#allocation5], 1 }

</bundles_post_ra>
